<compile_context>
chip_gen: v7x
topology: tpu7x:2x2x1
jax: 0.10.0
libtpu: 0.0.40
codegen_flags: <defaults>
</compile_context>

<pallas_src>
import functools

import jax
import jax.numpy as jnp
from jax.experimental import pallas as pl
from jax.experimental.pallas import tpu as pltpu

NUM_GROUPS = 8                   # TODO(synk): assumed group count for norm()
ACT_DTYPE = jnp.bfloat16         # inter-kernel activation dtype (halves HBM traffic)
MXU_DTYPE = jnp.bfloat16         # GEMM operand dtype (bf16-native MXU)
VMEM_LIMIT = 64 * 1024 * 1024    # explicit scoped-VMEM budget for heavy kernels


def _round_up(x, m):
    return (x + m - 1) // m * m


def _gemm_tiles(M, K, N):
    """Lane/sublane-dense tiles: Kp/Np multiples of 128, Mp >= 16."""
    if M <= 256:
        Mp = _round_up(M, 16)
        tm = Mp
    else:
        Mp = _round_up(M, 128)
        tm = 256 if Mp % 256 == 0 else 128
    Kp = _round_up(K, 128)
    if Kp <= 1024:
        tk = Kp
    elif Kp % 512 == 0:
        tk = 512
    elif Kp % 256 == 0:
        tk = 256
    else:
        tk = 128
    Np = _round_up(N, 128)
    if Np <= 256:
        tn = Np
    else:
        tn = 256 if Np % 256 == 0 else 128
    return Mp, Kp, Np, tm, tk, tn


def _pad2(x, Mp, Np):
    M, N = x.shape
    if M == Mp and N == Np:
        return x
    return jnp.pad(x, ((0, Mp - M), (0, Np - N)))


# ----------------------------------------------------------------------------
# Tiled matmul kernel: bf16 operands, f32 accumulation,
# fused bias + SiLU + residual-add epilogue.
# ----------------------------------------------------------------------------
def _matmul_kernel(*refs, act, has_res):
    if has_res:
        a_ref, b_ref, bias_ref, res_ref, o_ref, acc_ref = refs
    else:
        a_ref, b_ref, bias_ref, o_ref, acc_ref = refs
        res_ref = None
    k = pl.program_id(2)

    @pl.when(k == 0)
    def _():
        acc_ref[...] = jnp.zeros_like(acc_ref)

    acc_ref[...] += jnp.dot(a_ref[...], b_ref[...],
                            preferred_element_type=jnp.float32)

    @pl.when(k == pl.num_programs(2) - 1)
    def _():
        out = acc_ref[...] + bias_ref[...].astype(jnp.float32)
        if act == "silu":
            out = out * jax.nn.sigmoid(out)
        if res_ref is not None:
            out = out + res_ref[...].astype(jnp.float32)
        o_ref[...] = out.astype(o_ref.dtype)


@functools.lru_cache(maxsize=None)
def _matmul_call(Mp, Kp, Np, tm, tk, tn, act, has_res):
    kernel = functools.partial(_matmul_kernel, act=act, has_res=has_res)
    in_specs = [pl.BlockSpec((tm, tk), lambda i, j, k: (i, k)),
                pl.BlockSpec((tk, tn), lambda i, j, k: (k, j)),
                pl.BlockSpec((1, tn), lambda i, j, k: (0, j))]
    if has_res:
        in_specs.append(pl.BlockSpec((tm, tn), lambda i, j, k: (i, j)))
    return jax.jit(pl.pallas_call(
        kernel,
        out_shape=jax.ShapeDtypeStruct((Mp, Np), ACT_DTYPE),
        grid_spec=pltpu.PrefetchScalarGridSpec(
            num_scalar_prefetch=0,
            grid=(Mp // tm, Np // tn, Kp // tk),
            in_specs=in_specs,
            out_specs=pl.BlockSpec((tm, tn), lambda i, j, k: (i, j)),
            scratch_shapes=[pltpu.VMEM((tm, tn), jnp.float32)]),
        compiler_params=pltpu.CompilerParams(
            dimension_semantics=("parallel", "parallel", "arbitrary"),
            vmem_limit_bytes=VMEM_LIMIT),
    ))


def pallas_matmul(a, b, bias=None, act=None, res=None):
    """a: (M, K), b: (K, N), bias: (N,), res: (M, N) -> (M, N) in ACT_DTYPE."""
    M, K = a.shape
    K2, N = b.shape
    assert K == K2
    Mp, Kp, Np, tm, tk, tn = _gemm_tiles(M, K, N)
    a_p = _pad2(a.astype(MXU_DTYPE), Mp, Kp)
    b_p = _pad2(b.astype(MXU_DTYPE), Kp, Np)
    if bias is None:
        bias_p = jnp.zeros((1, Np), jnp.float32)
    else:
        bias_p = _pad2(bias.astype(jnp.float32).reshape(1, N), 1, Np)
    args = [a_p, b_p, bias_p]
    has_res = res is not None
    if has_res:
        args.append(_pad2(res.astype(ACT_DTYPE), Mp, Np))
    out = _matmul_call(Mp, Kp, Np, tm, tk, tn, act, has_res)(*args)
    if Mp != M or Np != N:
        out = out[:M, :N]
    return out


# ----------------------------------------------------------------------------
# Fused GeGLU GEMM: two accumulators, epilogue a * gelu(g), bf16 output.
# ----------------------------------------------------------------------------
def _geglu_kernel(x_ref, wa_ref, wg_ref, ba_ref, bg_ref, o_ref,
                  acca_ref, accg_ref):
    k = pl.program_id(2)

    @pl.when(k == 0)
    def _():
        acca_ref[...] = jnp.zeros_like(acca_ref)
        accg_ref[...] = jnp.zeros_like(accg_ref)

    x = x_ref[...]
    acca_ref[...] += jnp.dot(x, wa_ref[...], preferred_element_type=jnp.float32)
    accg_ref[...] += jnp.dot(x, wg_ref[...], preferred_element_type=jnp.float32)

    @pl.when(k == pl.num_programs(2) - 1)
    def _():
        a = acca_ref[...] + ba_ref[...].astype(jnp.float32)
        g = accg_ref[...] + bg_ref[...].astype(jnp.float32)
        # TODO(synk): tanh-approximate GELU in-kernel (reference nn.GELU uses
        # exact erf; deviation is ~1e-3, comparable to bf16 activation noise).
        o_ref[...] = (a * jax.nn.gelu(g, approximate=True)).astype(o_ref.dtype)


@functools.lru_cache(maxsize=None)
def _geglu_call(Mp, Kp, Np, tm, tk, tn):
    return jax.jit(pl.pallas_call(
        _geglu_kernel,
        out_shape=jax.ShapeDtypeStruct((Mp, Np), ACT_DTYPE),
        grid_spec=pltpu.PrefetchScalarGridSpec(
            num_scalar_prefetch=0,
            grid=(Mp // tm, Np // tn, Kp // tk),
            in_specs=[pl.BlockSpec((tm, tk), lambda i, j, k: (i, k)),
                      pl.BlockSpec((tk, tn), lambda i, j, k: (k, j)),
                      pl.BlockSpec((tk, tn), lambda i, j, k: (k, j)),
                      pl.BlockSpec((1, tn), lambda i, j, k: (0, j)),
                      pl.BlockSpec((1, tn), lambda i, j, k: (0, j))],
            out_specs=pl.BlockSpec((tm, tn), lambda i, j, k: (i, j)),
            scratch_shapes=[pltpu.VMEM((tm, tn), jnp.float32),
                            pltpu.VMEM((tm, tn), jnp.float32)]),
        compiler_params=pltpu.CompilerParams(
            dimension_semantics=("parallel", "parallel", "arbitrary"),
            vmem_limit_bytes=VMEM_LIMIT),
    ))


def pallas_geglu(x, wa, ba, wg, bg):
    """x: (M, K); wa/wg: (K, d_ff) -> a * gelu(g): (M, d_ff) bf16."""
    M, K = x.shape
    N = wa.shape[1]
    Mp, Kp, Np, tm, tk, tn = _gemm_tiles(M, K, N)
    out = _geglu_call(Mp, Kp, Np, tm, tk, tn)(
        _pad2(x.astype(MXU_DTYPE), Mp, Kp),
        _pad2(wa.astype(MXU_DTYPE), Kp, Np),
        _pad2(wg.astype(MXU_DTYPE), Kp, Np),
        _pad2(ba.astype(jnp.float32).reshape(1, N), 1, Np),
        _pad2(bg.astype(jnp.float32).reshape(1, N), 1, Np))
    if Mp != M or Np != N:
        out = out[:M, :N]
    return out


# ----------------------------------------------------------------------------
# Fused 3x3 stride-1 conv: padded NHWC image flattened to (Hp*Wp, Cin); the
# kernel accumulates the 9 taps as contiguous shifted-row GEMMs (no im2col
# materialization).  Output carries Wp-Wo junk columns per row + Cout padding,
# both sliced off in the wrapper.  Bias/SiLU/residual fused in the epilogue.
# ----------------------------------------------------------------------------
def _conv3s1_kernel(*refs, kh, kw, Wp, HoWp, act, has_res):
    if has_res:
        x_ref, w_ref, b_ref, res_ref, o_ref, acc_ref = refs
    else:
        x_ref, w_ref, b_ref, o_ref, acc_ref = refs
        res_ref = None
    acc_ref[...] = jnp.zeros_like(acc_ref)
    for i in range(kh):
        for j in range(kw):
            a = x_ref[0, pl.ds(i * Wp + j, HoWp), :]          # (Ho*Wp, Cin)
            acc_ref[...] += jnp.dot(a, w_ref[i * kw + j],
                                    preferred_element_type=jnp.float32)
    out = acc_ref[...] + b_ref[...].astype(jnp.float32)
    if act == "silu":
        out = out * jax.nn.sigmoid(out)
    if res_ref is not None:
        out = out + res_ref[0].astype(jnp.float32)
    o_ref[0] = out.astype(o_ref.dtype)


@functools.lru_cache(maxsize=None)
def _conv3s1_call(N, Lp, Cin, HoWp, Wp, Coutp, tco, kh, kw, act, has_res):
    kernel = functools.partial(_conv3s1_kernel, kh=kh, kw=kw, Wp=Wp,
                               HoWp=HoWp, act=act, has_res=has_res)
    in_specs = [pl.BlockSpec((1, Lp, Cin), lambda n, co: (n, 0, 0)),
                pl.BlockSpec((kh * kw, Cin, tco), lambda n, co: (0, 0, co)),
                pl.BlockSpec((1, tco), lambda n, co: (0, co))]
    if has_res:
        in_specs.append(pl.BlockSpec((1, HoWp, tco), lambda n, co: (n, 0, co)))
    return jax.jit(pl.pallas_call(
        kernel,
        out_shape=jax.ShapeDtypeStruct((N, HoWp, Coutp), ACT_DTYPE),
        grid_spec=pltpu.PrefetchScalarGridSpec(
            num_scalar_prefetch=0,
            grid=(N, Coutp // tco),
            in_specs=in_specs,
            out_specs=pl.BlockSpec((1, HoWp, tco), lambda n, co: (n, 0, co)),
            scratch_shapes=[pltpu.VMEM((HoWp, tco), jnp.float32)]),
        compiler_params=pltpu.CompilerParams(
            dimension_semantics=("parallel", "parallel"),
            vmem_limit_bytes=VMEM_LIMIT),
    ))


def _conv3x3_s1(x, w, b, padding, act, res):
    N, H, W, Cin = x.shape
    Cout, _, kh, kw = w.shape
    p = padding
    Ho = H + 2 * p - kh + 1
    Wo = W + 2 * p - kw + 1
    Wp = W + 2 * p
    # one extra zero row at the bottom keeps every tap's flattened window in-bounds
    xp = jnp.pad(x.astype(MXU_DTYPE), ((0, 0), (p, p + 1), (p, p), (0, 0)))
    Lp = (H + 2 * p + 1) * Wp
    xf = xp.reshape(N, Lp, Cin)
    HoWp = Ho * Wp

    Coutp = _round_up(Cout, 128)
    wt = w.transpose(2, 3, 1, 0).reshape(kh * kw, Cin, Cout).astype(MXU_DTYPE)
    if Coutp != Cout:
        wt = jnp.pad(wt, ((0, 0), (0, 0), (0, Coutp - Cout)))
    if b is None:
        bias = jnp.zeros((1, Coutp), jnp.float32)
    else:
        bias = jnp.pad(b.astype(jnp.float32).reshape(1, Cout),
                       ((0, 0), (0, Coutp - Cout)))
    args = [xf, wt, bias]
    has_res = res is not None
    if has_res:
        rr = jnp.pad(res.astype(ACT_DTYPE),
                     ((0, 0), (0, 0), (0, Wp - Wo), (0, Coutp - Cout)))
        args.append(rr.reshape(N, HoWp, Coutp))
    tco = 256 if Coutp % 256 == 0 else 128
    out = _conv3s1_call(N, Lp, Cin, HoWp, Wp, Coutp, tco, kh, kw, act, has_res)(*args)
    return out.reshape(N, Ho, Wp, Coutp)[:, :, :Wo, :Cout]


def conv2d(x, w, b, stride=1, padding=1, act=None, res=None):
    """x: (N, H, W, Cin) NHWC; w: (Cout, Cin, kh, kw) PyTorch layout."""
    N, H, W, Cin = x.shape
    Cout, _, kh, kw = w.shape
    if kh == 1 and kw == 1:
        A = x.reshape(N * H * W, Cin)
        Bm = w.reshape(Cout, Cin).T
        r = None if res is None else res.reshape(N * H * W, Cout)
        out = pallas_matmul(A, Bm, b, act=act, res=r)
        return out.reshape(N, H, W, Cout)
    if stride == 1:
        return _conv3x3_s1(x, w, b, padding, act, res)
    # TODO(synk): stride-2 (DownSample) conv still materializes im2col patches;
    # fold into a phase-decomposed fused kernel like the stride-1 path.
    xp = jnp.pad(x, ((0, 0), (padding, padding), (padding, padding), (0, 0)))
    Ho = (H + 2 * padding - kh) // stride + 1
    Wo = (W + 2 * padding - kw) // stride + 1
    cols = []
    for i in range(kh):
        for j in range(kw):
            cols.append(xp[:, i:i + stride * (Ho - 1) + 1:stride,
                           j:j + stride * (Wo - 1) + 1:stride, :])
    patches = jnp.concatenate(cols, axis=-1)
    A = patches.reshape(N * Ho * Wo, kh * kw * Cin)
    Bm = w.transpose(2, 3, 1, 0).reshape(kh * kw * Cin, Cout)
    r = None if res is None else res.reshape(N * Ho * Wo, Cout)
    out = pallas_matmul(A, Bm, b, act=act, res=r)
    return out.reshape(N, Ho, Wo, Cout)


# ----------------------------------------------------------------------------
# GroupNorm on NHWC, two-pass (stats -> apply), HW tiled on a grid axis so the
# f32 working set stays bounded on v5e/v7x.  Time-embedding add and SiLU fused.
# ----------------------------------------------------------------------------
def _gn_stats_kernel(x_ref, add_ref, g_ref, b_ref, mavg_ref, mbc_ref, ss_ref,
                     sum_sc, sq_sc, *, eps):
    hb = pl.program_id(1)

    @pl.when(hb == 0)
    def _():
        sum_sc[...] = jnp.zeros_like(sum_sc)
        sq_sc[...] = jnp.zeros_like(sq_sc)

    x = x_ref[0].astype(jnp.float32) + add_ref[0].astype(jnp.float32)  # (ths, C)
    sum_sc[...] += jnp.sum(x, axis=0, keepdims=True)
    sq_sc[...] += jnp.sum(x * x, axis=0, keepdims=True)

    @pl.when(hb == pl.num_programs(1) - 1)
    def _():
        mavg = mavg_ref[...]                                  # (C, G) incl. 1/(HW*cg)
        mbc = mbc_ref[...]                                    # (G, C)
        mean = jnp.dot(jnp.dot(sum_sc[...], mavg, preferred_element_type=jnp.float32),
                       mbc, preferred_element_type=jnp.float32)
        ex2 = jnp.dot(jnp.dot(sq_sc[...], mavg, preferred_element_type=jnp.float32),
                      mbc, preferred_element_type=jnp.float32)
        var = ex2 - mean * mean
        rstd = jax.lax.rsqrt(var + eps)
        scale = g_ref[0].astype(jnp.float32) * rstd           # (1, C)
        shift = b_ref[0].astype(jnp.float32) - mean * scale   # (1, C)
        ss_ref[0] = jnp.concatenate([scale, shift], axis=0)   # (2, C)


def _gn_apply_kernel(x_ref, add_ref, ss_ref, o_ref, *, act):
    x = x_ref[0].astype(jnp.float32) + add_ref[0].astype(jnp.float32)
    ss = ss_ref[0]
    y = x * ss[0:1, :] + ss[1:2, :]
    if act == "silu":
        y = y * jax.nn.sigmoid(y)
    o_ref[0] = y.astype(o_ref.dtype)


@functools.lru_cache(maxsize=None)
def _gn_stats_call(N, HW, ths, C, G, eps):
    kernel = functools.partial(_gn_stats_kernel, eps=eps)
    return jax.jit(pl.pallas_call(
        kernel,
        out_shape=jax.ShapeDtypeStruct((N, 2, C), jnp.float32),
        grid_spec=pltpu.PrefetchScalarGridSpec(
            num_scalar_prefetch=0,
            grid=(N, HW // ths),
            in_specs=[pl.BlockSpec((1, ths, C), lambda n, h: (n, h, 0)),
                      pl.BlockSpec((1, 1, C), lambda n, h: (n, 0, 0)),
                      pl.BlockSpec((1, 1, C), lambda n, h: (0, 0, 0)),
                      pl.BlockSpec((1, 1, C), lambda n, h: (0, 0, 0)),
                      pl.BlockSpec((C, G), lambda n, h: (0, 0)),
                      pl.BlockSpec((G, C), lambda n, h: (0, 0))],
            out_specs=pl.BlockSpec((1, 2, C), lambda n, h: (n, 0, 0)),
            scratch_shapes=[pltpu.VMEM((1, C), jnp.float32),
                            pltpu.VMEM((1, C), jnp.float32)]),
        compiler_params=pltpu.CompilerParams(
            dimension_semantics=("parallel", "arbitrary"),
            vmem_limit_bytes=VMEM_LIMIT),
    ))


@functools.lru_cache(maxsize=None)
def _gn_apply_call(N, HW, ths, C, act):
    kernel = functools.partial(_gn_apply_kernel, act=act)
    return jax.jit(pl.pallas_call(
        kernel,
        out_shape=jax.ShapeDtypeStruct((N, HW, C), ACT_DTYPE),
        grid_spec=pltpu.PrefetchScalarGridSpec(
            num_scalar_prefetch=0,
            grid=(N, HW // ths),
            in_specs=[pl.BlockSpec((1, ths, C), lambda n, h: (n, h, 0)),
                      pl.BlockSpec((1, 1, C), lambda n, h: (n, 0, 0)),
                      pl.BlockSpec((1, 2, C), lambda n, h: (n, 0, 0))],
            out_specs=pl.BlockSpec((1, ths, C), lambda n, h: (n, h, 0))),
        compiler_params=pltpu.CompilerParams(
            dimension_semantics=("parallel", "parallel"),
            vmem_limit_bytes=VMEM_LIMIT),
    ))


def pallas_groupnorm(x, gamma, beta, groups=NUM_GROUPS, eps=1e-5, act=None,
                     add=None):
    """x: (N, H, W, C) NHWC; optional per-(N, C) `add` fused before the stats."""
    N, H, W, C = x.shape
    assert C % groups == 0
    cg = C // groups
    HW = H * W
    ths = HW
    for cand in (2048, 1024, 512):
        if HW > cand and HW % cand == 0:
            ths = cand
            break
    xr = x.reshape(N, HW, C).astype(ACT_DTYPE)
    add_r = (jnp.zeros((N, 1, C), ACT_DTYPE) if add is None
             else add.reshape(N, 1, C).astype(ACT_DTYPE))
    g = gamma.astype(jnp.float32).reshape(1, 1, C)
    b = beta.astype(jnp.float32).reshape(1, 1, C)
    onehot = jax.nn.one_hot(jnp.arange(C) // cg, groups, dtype=jnp.float32)
    mavg = onehot / float(HW * cg)                 # (C, G): per-group averaging
    mbc = onehot.T                                 # (G, C): broadcast back
    ss = _gn_stats_call(N, HW, ths, C, groups, float(eps))(xr, add_r, g, b, mavg, mbc)
    out = _gn_apply_call(N, HW, ths, C, act)(xr, add_r, ss)
    return out.reshape(N, H, W, C)


# ----------------------------------------------------------------------------
# LayerNorm (row stats over channels, sequence dim tiled on the grid)
# ----------------------------------------------------------------------------
def _layernorm_kernel(x_ref, g_ref, b_ref, o_ref, *, eps):
    x = x_ref[0].astype(jnp.float32)               # (ts, C)
    mean = jnp.mean(x, axis=-1, keepdims=True)
    xc = x - mean
    var = jnp.mean(xc * xc, axis=-1, keepdims=True)
    y = xc * jax.lax.rsqrt(var + eps)
    y = y * g_ref[0].astype(jnp.float32) + b_ref[0].astype(jnp.float32)
    o_ref[0] = y.astype(o_ref.dtype)


@functools.lru_cache(maxsize=None)
def _layernorm_call(B, S, ts, C, eps):
    kernel = functools.partial(_layernorm_kernel, eps=eps)
    return jax.jit(pl.pallas_call(
        kernel,
        out_shape=jax.ShapeDtypeStruct((B, S, C), ACT_DTYPE),
        grid_spec=pltpu.PrefetchScalarGridSpec(
            num_scalar_prefetch=0,
            grid=(B, S // ts),
            in_specs=[pl.BlockSpec((1, ts, C), lambda b, s: (b, s, 0)),
                      pl.BlockSpec((1, 1, C), lambda b, s: (0, 0, 0)),
                      pl.BlockSpec((1, 1, C), lambda b, s: (0, 0, 0))],
            out_specs=pl.BlockSpec((1, ts, C), lambda b, s: (b, s, 0))),
        compiler_params=pltpu.CompilerParams(
            dimension_semantics=("parallel", "parallel"),
            vmem_limit_bytes=VMEM_LIMIT),
    ))


def pallas_layernorm(x, gamma, beta, eps=1e-5):
    B, S, C = x.shape
    ts = S
    for cand in (1024, 512, 256):
        if S > cand and S % cand == 0:
            ts = cand
            break
    g = gamma.astype(jnp.float32).reshape(1, 1, C)
    b = beta.astype(jnp.float32).reshape(1, 1, C)
    return _layernorm_call(B, S, ts, C, float(eps))(x.astype(ACT_DTYPE), g, b)


# ----------------------------------------------------------------------------
# Flash attention: (B, S, nh*dh) layout in/out (no XLA head transposes), heads
# split in-kernel, online softmax over kv tiles, single lane-dense output store.
# Q is pre-scaled (softmax scale folded into the projection weights).
# ----------------------------------------------------------------------------
def _flash_attn_kernel(q_ref, k_ref, v_ref, o_ref, m_sc, l_sc, acc_sc,
                       *, nh, dh, tk, sk, need_mask):
    ki = pl.program_id(2)

    @pl.when(ki == 0)
    def _():
        m_sc[...] = jnp.full_like(m_sc, -1e30)
        l_sc[...] = jnp.zeros_like(l_sc)
        acc_sc[...] = jnp.zeros_like(acc_sc)

    q = q_ref[0]                                    # (tq, nh*dh) bf16 (pre-scaled)
    k = k_ref[0]                                    # (tk, nh*dh)
    v = v_ref[0]

    for h in range(nh):
        qh = q[:, h * dh:(h + 1) * dh]
        kh = k[:, h * dh:(h + 1) * dh]
        vh = v[:, h * dh:(h + 1) * dh]
        s = jax.lax.dot_general(qh, kh, (((1,), (1,)), ((), ())),
                                preferred_element_type=jnp.float32)   # (tq, tk)
        if need_mask:
            col = ki * tk + jax.lax.broadcasted_iota(jnp.int32, s.shape, 1)
            s = jnp.where(col < sk, s, -1e30)
        m_prev = m_sc[h]                                               # (tq, 1)
        m_new = jnp.maximum(m_prev, jnp.max(s, axis=-1, keepdims=True))
        alpha = jnp.exp(m_prev - m_new)
        p = jnp.exp(s - m_new)
        if need_mask:
            p = jnp.where(col < sk, p, 0.0)
        l_sc[h] = alpha * l_sc[h] + jnp.sum(p, axis=-1, keepdims=True)
        acc_sc[h] = alpha * acc_sc[h] + jnp.dot(p.astype(vh.dtype), vh,
                                                preferred_element_type=jnp.float32)
        m_sc[h] = m_new

    @pl.when(ki == pl.num_programs(2) - 1)
    def _():
        outs = [acc_sc[h] * pl.reciprocal(l_sc[h], approx=True) for h in range(nh)]
        o_ref[0] = jnp.concatenate(outs, axis=-1).astype(o_ref.dtype)


@functools.lru_cache(maxsize=None)
def _attention_call(B, nh, dh, Sqp, Skp, tq, tk, sk_actual):
    d_attn = nh * dh
    kernel = functools.partial(_flash_attn_kernel, nh=nh, dh=dh, tk=tk,
                               sk=sk_actual, need_mask=(Skp != sk_actual))
    return jax.jit(pl.pallas_call(
        kernel,
        out_shape=jax.ShapeDtypeStruct((B, Sqp, d_attn), ACT_DTYPE),
        grid_spec=pltpu.PrefetchScalarGridSpec(
            num_scalar_prefetch=0,
            grid=(B, Sqp // tq, Skp // tk),
            in_specs=[pl.BlockSpec((1, tq, d_attn), lambda b, qi, ki: (b, qi, 0)),
                      pl.BlockSpec((1, tk, d_attn), lambda b, qi, ki: (b, ki, 0)),
                      pl.BlockSpec((1, tk, d_attn), lambda b, qi, ki: (b, ki, 0))],
            out_specs=pl.BlockSpec((1, tq, d_attn), lambda b, qi, ki: (b, qi, 0)),
            scratch_shapes=[pltpu.VMEM((nh, tq, 1), jnp.float32),
                            pltpu.VMEM((nh, tq, 1), jnp.float32),
                            pltpu.VMEM((nh, tq, dh), jnp.float32)]),
        compiler_params=pltpu.CompilerParams(
            dimension_semantics=("parallel", "parallel", "arbitrary"),
            vmem_limit_bytes=VMEM_LIMIT),
    ))


def pallas_attention(q, k, v, nh):
    """q: (B, Sq, nh*dh) pre-scaled, k/v: (B, Sk, nh*dh) -> (B, Sq, nh*dh)."""
    B, Sq, d_attn = q.shape
    Sk = k.shape[1]
    dh = d_attn // nh
    if Sq <= 256:
        Sqp, tq = Sq, Sq
    else:
        Sqp, tq = _round_up(Sq, 256), 256
    if Sk <= 256:
        Skp, tk = Sk, Sk
    else:
        Skp, tk = _round_up(Sk, 256), 256
    qp = q if Sqp == Sq else jnp.pad(q, ((0, 0), (0, Sqp - Sq), (0, 0)))
    kp = k if Skp == Sk else jnp.pad(k, ((0, 0), (0, Skp - Sk), (0, 0)))
    vp = v if Skp == Sk else jnp.pad(v, ((0, 0), (0, Skp - Sk), (0, 0)))
    out = _attention_call(B, nh, dh, Sqp, Skp, tq, tk, Sk)(
        qp.astype(MXU_DTYPE), kp.astype(MXU_DTYPE), vp.astype(MXU_DTYPE))
    if Sqp != Sq:
        out = out[:, :Sq, :]
    return out


# ----------------------------------------------------------------------------
# Parameter init (PyTorch-style layouts)
# ----------------------------------------------------------------------------
def _rand_w(key, shape):
    return jax.random.normal(key, shape, jnp.float32) * 0.02


def _init_linear(key, din, dout):
    return {'w': _rand_w(key, (dout, din)), 'b': jnp.zeros((dout,), jnp.float32)}


def _init_conv(key, cin, cout, k):
    return {'w': _rand_w(key, (cout, cin, k, k)),
            'b': jnp.zeros((cout,), jnp.float32)}


def _init_norm(c):
    return {'g': jnp.ones((c,), jnp.float32), 'b': jnp.zeros((c,), jnp.float32)}


def _init_resblock(key, t_dim, cin, cout=None):
    cout = cin if cout is None else cout
    ks = jax.random.split(key, 4)
    return {'kind': 'resblock', 'cin': cin, 'cout': cout,
            'norm1': _init_norm(cin),
            'conv1': _init_conv(ks[0], cin, cout, 3),
            'emb': _init_linear(ks[1], t_dim, cout),
            'norm2': _init_norm(cout),
            'conv2': _init_conv(ks[2], cout, cout, 3),
            'skip': (_init_conv(ks[3], cin, cout, 1) if cin != cout else None)}


def _init_tf_block(key, d, c_dim, dh, nh):
    ks = jax.random.split(key, 11)
    d_attn = nh * dh
    d_ff = 4 * d
    return {
        'nh': nh, 'dh': dh,
        'ln1': _init_norm(d),
        'attn1': {'wq': _rand_w(ks[0], (d_attn, d)),
                  'wk': _rand_w(ks[1], (d_attn, d)),
                  'wv': _rand_w(ks[2], (d_attn, d)),
                  'wo_w': _rand_w(ks[3], (d, d_attn)),
                  'wo_b': jnp.zeros((d,), jnp.float32)},
        'ln2': _init_norm(d),
        'attn2': {'wq': _rand_w(ks[4], (d_attn, d)),
                  'wk': _rand_w(ks[5], (d_attn, c_dim)),
                  'wv': _rand_w(ks[6], (d_attn, c_dim)),
                  'wo_w': _rand_w(ks[7], (d, d_attn)),
                  'wo_b': jnp.zeros((d,), jnp.float32)},
        'ln3': _init_norm(d),
        'ff': {'wa': _rand_w(ks[8], (d_ff, d)), 'ba': jnp.zeros((d_ff,), jnp.float32),
               'wg': _rand_w(ks[9], (d_ff, d)), 'bg': jnp.zeros((d_ff,), jnp.float32),
               'wo': _rand_w(ks[10], (d, d_ff)), 'bo': jnp.zeros((d,), jnp.float32)},
    }


def _init_st(key, ch, n_tf, n_heads, c_dim):
    ks = jax.random.split(key, 2 + n_tf)
    return {'kind': 'st', 'ch': ch,
            'norm': _init_norm(ch),
            'conv_in': _init_conv(ks[0], ch, ch, 1),
            'conv_out': _init_conv(ks[1], ch, ch, 1),
            'blocks': [_init_tf_block(ks[2 + i], ch, c_dim, ch // n_heads, n_heads)
                       for i in range(n_tf)]}


def init_unet(key, cfg):
    keys = iter(jax.random.split(key, 256))
    hc = cfg['h_channels']
    t_dim = hc * 4
    params = {}
    params['t_emb'] = {'l1': _init_linear(next(keys), hc, t_dim),
                       'l2': _init_linear(next(keys), t_dim, t_dim)}

    in_layers = [[{'kind': 'conv3', **_init_conv(next(keys), cfg['in_channels'], hc, 3)}]]
    in_ch_stack = [hc]
    channels = [m * cfg['h_channels'] for m in cfg['ch_multipliers']]
    cur = hc
    for i in range(len(channels)):
        for _ in range(cfg['n_resnets']):
            layers = [_init_resblock(next(keys), t_dim, cur, channels[i])]
            cur = channels[i]
            if i in cfg['attn_levels']:
                layers.append(_init_st(next(keys), cur, cfg['n_transformers'],
                                       cfg['n_heads'], cfg['c_dim']))
            in_layers.append(layers)
            in_ch_stack.append(cur)
        if i != len(channels) - 1:
            in_layers.append([{'kind': 'down', **_init_conv(next(keys), cur, cur, 3)}])
            in_ch_stack.append(cur)
    params['in_layers'] = in_layers

    params['mid'] = [_init_resblock(next(keys), t_dim, cur),
                     _init_st(next(keys), cur, cfg['n_transformers'],
                              cfg['n_heads'], cfg['c_dim']),
                     _init_resblock(next(keys), t_dim, cur)]

    out_layers = []
    for i in reversed(range(len(channels))):
        for j in range(cfg['n_resnets'] + 1):
            layers = [_init_resblock(next(keys), t_dim, cur + in_ch_stack.pop(), channels[i])]
            cur = channels[i]
            if i in cfg['attn_levels']:
                layers.append(_init_st(next(keys), cur, cfg['n_transformers'],
                                       cfg['n_heads'], cfg['c_dim']))
            if i != 0 and j == cfg['n_resnets']:
                layers.append({'kind': 'up', **_init_conv(next(keys), cur, cur, 3)})
            out_layers.append(layers)
    params['out_layers'] = out_layers

    params['final'] = {'norm': _init_norm(cur),
                       'conv': _init_conv(next(keys), cur, cfg['out_channels'], 3)}
    return params


# ----------------------------------------------------------------------------
# Forward pass (NHWC internally)
# ----------------------------------------------------------------------------
def res_block(p, x, t_e):
    h = pallas_groupnorm(x, p['norm1']['g'], p['norm1']['b'], act='silu')
    h = conv2d(h, p['conv1']['w'], p['conv1']['b'])
    emb = jax.nn.silu(t_e.astype(jnp.float32))                    # (B, t_dim)
    emb = pallas_matmul(emb, p['emb']['w'].T, p['emb']['b'])      # (B, cout)
    skip = x if p['skip'] is None else conv2d(x, p['skip']['w'], p['skip']['b'])
    # h + emb broadcast is fused into the GroupNorm; skip add fused into conv2.
    h = pallas_groupnorm(h, p['norm2']['g'], p['norm2']['b'], act='silu', add=emb)
    h = conv2d(h, p['conv2']['w'], p['conv2']['b'], res=skip)
    return h


def attention_layer(p, x, cond, nh, dh, residual):
    B, S, D = x.shape
    d_attn = nh * dh
    scale = dh ** -0.5
    if cond is None:
        # softmax scale folded into wq (free); Q/K/V in one wide GEMM.
        wqkv = jnp.concatenate([p['wq'].T * scale, p['wk'].T, p['wv'].T], axis=1)
        qkv = pallas_matmul(x.reshape(B * S, D), wqkv)            # (B*S, 3*d_attn)
        q = qkv[:, :d_attn].reshape(B, S, d_attn)
        k = qkv[:, d_attn:2 * d_attn].reshape(B, S, d_attn)
        v = qkv[:, 2 * d_attn:].reshape(B, S, d_attn)
    else:
        Sk, Dk = cond.shape[1], cond.shape[2]
        q = pallas_matmul(x.reshape(B * S, D), p['wq'].T * scale).reshape(B, S, d_attn)
        wkv = jnp.concatenate([p['wk'].T, p['wv'].T], axis=1)
        kv = pallas_matmul(cond.reshape(B * Sk, Dk), wkv)         # (B*Sk, 2*d_attn)
        k = kv[:, :d_attn].reshape(B, Sk, d_attn)
        v = kv[:, d_attn:].reshape(B, Sk, d_attn)
    o = pallas_attention(q, k, v, nh)                             # (B, S, nh*dh)
    out = pallas_matmul(o.reshape(B * S, d_attn), p['wo_w'].T, p['wo_b'],
                        res=residual.reshape(B * S, D))
    return out.reshape(B, S, D)


def feed_forward(p, x, residual):
    B, S, D = x.shape
    xf = x.reshape(B * S, D)
    h = pallas_geglu(xf, p['wa'].T, p['ba'], p['wg'].T, p['bg'])  # (B*S, d_ff) bf16
    out = pallas_matmul(h, p['wo'].T, p['bo'], res=residual.reshape(B * S, D))
    return out.reshape(B, S, D)


def transformer_block(p, x, c):
    h = pallas_layernorm(x, p['ln1']['g'], p['ln1']['b'])
    x = attention_layer(p['attn1'], h, None, p['nh'], p['dh'], residual=x)
    h = pallas_layernorm(x, p['ln2']['g'], p['ln2']['b'])
    x = attention_layer(p['attn2'], h, c, p['nh'], p['dh'], residual=x)
    h = pallas_layernorm(x, p['ln3']['g'], p['ln3']['b'])
    x = feed_forward(p['ff'], h, residual=x)
    return x


def spatial_transformer(p, x, c):
    x_in = x
    N, H, W, C = x.shape
    h = pallas_groupnorm(x, p['norm']['g'], p['norm']['b'], eps=1e-6)
    h = conv2d(h, p['conv_in']['w'], p['conv_in']['b'])
    h = h.reshape(N, H * W, C)                                    # NHWC -> (B, S, C)
    for blk in p['blocks']:
        h = transformer_block(blk, h, c)
    h = h.reshape(N, H, W, C)
    h = conv2d(h, p['conv_out']['w'], p['conv_out']['b'], res=x_in)
    return h


def apply_layer(layer, x, t_e, c):
    kind = layer['kind']
    if kind == 'conv3':
        return conv2d(x, layer['w'], layer['b'], stride=1, padding=1)
    if kind == 'down':
        return conv2d(x, layer['w'], layer['b'], stride=2, padding=1)
    if kind == 'up':
        # TODO(synk): fold nearest-x2 upsample into the conv's input indexing
        # (phase-decomposed sub-pixel conv) instead of materializing the repeat.
        x = jnp.repeat(jnp.repeat(x, 2, axis=1), 2, axis=2)
        return conv2d(x, layer['w'], layer['b'], stride=1, padding=1)
    if kind == 'resblock':
        return res_block(layer, x, t_e)
    if kind == 'st':
        return spatial_transformer(layer, x, c)
    raise ValueError(kind)


def apply_seq(layers, x, t_e, c):
    for l in layers:
        x = apply_layer(l, x, t_e, c)
    return x


def unet_forward(params, x, t, c, cfg):
    hc = cfg['h_channels']
    # time-step embedding (sin/cos), matches UNet.time_step_emb
    half = hc // 2
    freqs = jnp.exp(-jnp.log(10000.0) *
                    jnp.arange(half, dtype=jnp.float32) / half)
    args = t[:, None] * freqs[None]
    te = jnp.concatenate([jnp.sin(args), jnp.cos(args)], axis=-1)     # (B, hc)
    # t_emb MLP (Linear -> SiLU -> Linear), SiLU fused into the GEMM epilogue
    te = pallas_matmul(te, params['t_emb']['l1']['w'].T,
                       params['t_emb']['l1']['b'], act='silu')
    te = pallas_matmul(te, params['t_emb']['l2']['w'].T,
                       params['t_emb']['l2']['b'])

    x = x.transpose(0, 2, 3, 1).astype(ACT_DTYPE)                     # NCHW -> NHWC once
    c = c.astype(ACT_DTYPE)

    xs = []
    for layers in params['in_layers']:
        x = apply_seq(layers, x, te, c)
        xs.append(x)
    x = apply_seq(params['mid'], x, te, c)
    for layers in params['out_layers']:
        x = jnp.concatenate([x, xs.pop()], axis=-1)                   # channels-last concat
        x = apply_seq(layers, x, te, c)
    # final: norm + SiLU (fused) + conv3x3
    x = pallas_groupnorm(x, params['final']['norm']['g'],
                         params['final']['norm']['b'], act='silu')
    x = conv2d(x, params['final']['conv']['w'], params['final']['conv']['b'])
    return x.transpose(0, 3, 1, 2).astype(jnp.float32)                # back to NCHW


# ----------------------------------------------------------------------------
if __name__ == "__main__":
    cfg = dict(in_channels=4, out_channels=4, h_channels=32, c_dim=16,
               n_heads=4, n_resnets=1, n_transformers=1,
               ch_multipliers=[1, 2], attn_levels=[1])
    key = jax.random.PRNGKey(0)
    kp, kx, kt, kc = jax.random.split(key, 4)
    params = init_unet(kp, cfg)

    x = jax.random.normal(kx, (2, cfg['in_channels'], 16, 16), jnp.float32)
    t = jax.random.uniform(kt, (2,), jnp.float32, 0.0, 1000.0)
    c = jax.random.normal(kc, (2, 8, cfg['c_dim']), jnp.float32)

    # One jit over the whole forward: glue ops (pads, reshapes, concats) fuse
    # and params / cfg are captured as compile-time constants.
    fwd = jax.jit(lambda x_, t_, c_: unet_forward(params, x_, t_, c_, cfg))

    out = fwd(x, t, c)
    out = jax.block_until_ready(out)
    assert out.shape == (2, cfg['out_channels'], 16, 16), out.shape
    assert jnp.all(jnp.isfinite(out))
    print("KERNEL_OK")
</pallas_src>

<mosaic_0001>
module attributes {stable_mosaic.version = 11 : i64} {
  func.func @_matmul_kernel(%arg0: i32, %arg1: i32, %arg2: i32, %arg3: memref<16x128xbf16, #tpu.memory_space<vmem>>, %arg4: memref<128x128xbf16, #tpu.memory_space<vmem>>, %arg5: memref<1x128xf32, #tpu.memory_space<vmem>>, %arg6: memref<16x128xbf16, #tpu.memory_space<vmem>>, %arg7: memref<16x128xf32, #tpu.memory_space<vmem>>) attributes {dimension_semantics = [#tpu.dimension_semantics<parallel>, #tpu.dimension_semantics<parallel>, #tpu.dimension_semantics<arbitrary>], iteration_bounds = array<i64: 1, 1, 1>, scalar_prefetch = 0 : i64, scratch_operands = 1 : i64, tpu.core_type = #tpu.core_type<tc>, window_params = [{transform_indices = @transform_0, window_bounds = array<i64: 16, 128>}, {transform_indices = @transform_1, window_bounds = array<i64: 128, 128>}, {transform_indices = @transform_2, window_bounds = array<i64: 1, 128>}, {transform_indices = @transform_3, window_bounds = array<i64: 16, 128>}]} {
    %c0_i32 = arith.constant 0 : i32
    %0 = arith.cmpi eq, %arg2, %c0_i32 : i32
    %1 = arith.extui %0 : i1 to i32
    %c0_i32_0 = arith.constant 0 : i32
    %2 = arith.cmpi ne, %1, %c0_i32_0 : i32
    scf.if %2 {
      %cst_10 = arith.constant 0.000000e+00 : f32
      %12 = vector.broadcast %cst_10 : f32 to vector<16x128xf32>
      %c0_11 = arith.constant 0 : index
      %c0_12 = arith.constant 0 : index
      %13 = vector.load %arg7[%c0_11, %c0_12] : memref<16x128xf32, #tpu.memory_space<vmem>>, vector<16x128xf32>
      tpu.vector_store %arg7[%c0_11, %c0_12], %12 {strides = array<i32>} : memref<16x128xf32, #tpu.memory_space<vmem>>, vector<16x128xf32>,
    } else {
    }
    %c0 = arith.constant 0 : index
    %c0_1 = arith.constant 0 : index
    %3 = vector.load %arg7[%c0, %c0_1] : memref<16x128xf32, #tpu.memory_space<vmem>>, vector<16x128xf32>
    %c0_2 = arith.constant 0 : index
    %c0_3 = arith.constant 0 : index
    %4 = vector.load %arg3[%c0_2, %c0_3] : memref<16x128xbf16, #tpu.memory_space<vmem>>, vector<16x128xbf16>
    %c0_4 = arith.constant 0 : index
    %c0_5 = arith.constant 0 : index
    %5 = vector.load %arg4[%c0_4, %c0_5] : memref<128x128xbf16, #tpu.memory_space<vmem>>, vector<128x128xbf16>
    %cst = arith.constant dense<0.000000e+00> : vector<16x128xf32>
    %6 = tpu.matmul %4, %5, %cst {dimension_numbers = #tpu.dot_dimension_numbers<[1], [0], [0], [1], [0, 0, 1, 1], [], []>} : vector<16x128xbf16>, vector<128x128xbf16>, vector<16x128xf32> -> vector<16x128xf32>
    %7 = arith.addf %3, %6 : vector<16x128xf32>
    %c0_6 = arith.constant 0 : index
    %c0_7 = arith.constant 0 : index
    %8 = vector.load %arg7[%c0_6, %c0_7] : memref<16x128xf32, #tpu.memory_space<vmem>>, vector<16x128xf32>
    tpu.vector_store %arg7[%c0_6, %c0_7], %7 {strides = array<i32>} : memref<16x128xf32, #tpu.memory_space<vmem>>, vector<16x128xf32>,
    %c0_i32_8 = arith.constant 0 : i32
    %9 = arith.cmpi eq, %arg2, %c0_i32_8 : i32
    %10 = arith.extui %9 : i1 to i32
    %c0_i32_9 = arith.constant 0 : i32
    %11 = arith.cmpi ne, %10, %c0_i32_9 : i32
    scf.if %11 {
      %c0_10 = arith.constant 0 : index
      %c0_11 = arith.constant 0 : index
      %12 = vector.load %arg7[%c0_10, %c0_11] : memref<16x128xf32, #tpu.memory_space<vmem>>, vector<16x128xf32>
      %c0_12 = arith.constant 0 : index
      %c0_13 = arith.constant 0 : index
      %13 = vector.load %arg5[%c0_12, %c0_13] : memref<1x128xf32, #tpu.memory_space<vmem>>, vector<1x128xf32>
      %14 = vector.broadcast %13 : vector<1x128xf32> to vector<16x128xf32>
      %15 = arith.addf %12, %14 : vector<16x128xf32>
      %16 = arith.negf %15 : vector<16x128xf32>
      %17 = math.exp %16 : vector<16x128xf32>
      %cst_14 = arith.constant 1.000000e+00 : f32
      %18 = vector.broadcast %cst_14 : f32 to vector<16x128xf32>
      %19 = arith.addf %18, %17 : vector<16x128xf32>
      %20 = arith.divf %18, %19 : vector<16x128xf32>
      %21 = arith.mulf %15, %20 : vector<16x128xf32>
      %22 = arith.truncf %21 : vector<16x128xf32> to vector<16x128xbf16>
      %c0_15 = arith.constant 0 : index
      %c0_16 = arith.constant 0 : index
      %23 = vector.load %arg6[%c0_15, %c0_16] : memref<16x128xbf16, #tpu.memory_space<vmem>>, vector<16x128xbf16>
      tpu.vector_store %arg6[%c0_15, %c0_16], %22 {strides = array<i32>} : memref<16x128xbf16, #tpu.memory_space<vmem>>, vector<16x128xbf16>,
    } else {
    }
    return
  }
  func.func @transform_0(%arg0: i32, %arg1: i32, %arg2: i32) -> (i32, i32) {
    %c0_i32 = arith.constant 0 : i32
    return %arg0, %arg2 : i32, i32
  }
  func.func @transform_1(%arg0: i32, %arg1: i32, %arg2: i32) -> (i32, i32) {
    %c0_i32 = arith.constant 0 : i32
    return %arg2, %arg1 : i32, i32
  }
  func.func @transform_2(%arg0: i32, %arg1: i32, %arg2: i32) -> (i32, i32) {
    %c0_i32 = arith.constant 0 : i32
    %c0_i32_0 = arith.constant 0 : i32
    return %c0_i32, %arg1 : i32, i32
  }
  func.func @transform_3(%arg0: i32, %arg1: i32, %arg2: i32) -> (i32, i32) {
    %c0_i32 = arith.constant 0 : i32
    return %arg0, %arg1 : i32, i32
  }
}

</mosaic_0001>

<bundles_post_ra>
// kernel: tpu_custom_call.1
= control target key start
LH: loop header
LB: loop body
LE: loop exit
PB: predicated region body
PF: predicated region fallthrough
CT: control target
= control target key end

     0   :  { %8 = vsyncpa [#allocation4], 0  ;;  %s497_s0 = inlined_call_operand.hbm [shape: bf16[16,128], index: 0, kind: input, shape index: {}]   ;;  %s498_s1 = inlined_call_operand.hbm [shape: bf16[128,128], index: 1, kind: input, shape index: {}]   ;;  %s499_s2 = inlined_call_operand.hbm [shape: f32[1,128], index: 2, kind: input, shape index: {}]   ;;  %s500_s3 = inlined_call_operand.hbm [shape: bf16[16,128], index: 3, kind: output, shape index: {}]  }
   0x1   :  { %9 = vsyncpa [#allocation7], 0 }
   0x2   :  { %10 = vsyncpa [#allocation5], 0  ;;  %s405_s12 = smov [#allocation6]   ;;  %s406_s14 = smov [#allocation3]  }
   0x3   :  { %s28_s13 = sshll.u32 %s405_s12, 4  ;;  %s16_s15 = sshll.u32 %s406_s14, 4  ;;  %s29_s13 = int_to_ptr.vmem [resolvable:$true] %s28_s13  ;;  %s433_s15 = int_to_ptr.vmem [resolvable:$true] %s16_s15 }
   0x4   :  { %s311_s18 = scalar_lea.hbm %s498_s1, 1024 }
   0x5   :  { %p312_p0 = scmp.ne.s32.totalorder %s498_s1, %s311_s18  ;;  %p315_p1 = scmp.lt.u32.totalorder %s311_s18, %s498_s1 }
   0x7   :  { %p317_p2 = pnand %p315_p1, %p312_p0 }
   0x9   :  { %320 = shalt.err (!%p317_p2)
}
   0xa   :  { %s321_s23 = scalar_lea.vmem %s29_s13, 1024  ;;  %p326_p4 = scmp.lt.s32.totalorder %s29_s13, %s29_s13 }
   0xb   :  { %p322_p3 = scmp.ne.s32.totalorder %s29_s13, %s321_s23  ;;  %p327_p5 = scmp.lt.s32.totalorder %s321_s23, %s321_s23 }
   0xd   :  { %p328_p6 = por %p327_p5, %p326_p4 }
   0xf   :  { %p329_p7 = pnand %p328_p6, %p322_p3 }
  0x11   :  { %332 = shalt.err (!%p329_p7)
}
  0x12   :  { %s407_s24 = smov 64   ;;  %s408_s25 = smov 4  }
  0x13   :  { %34 = dma.hbm_to_vmem [thread:$0]  %s498_s1, 1024, %s29_s13, [#allocation7], %s407_s24, %s407_s24, %s408_s25  }
  0x14   :  { %s333_s30 = scalar_lea.hbm %s497_s0, 128 }
  0x15   :  { %p334_p8 = scmp.ne.s32.totalorder %s497_s0, %s333_s30  ;;  %p337_p9 = scmp.lt.u32.totalorder %s333_s30, %s497_s0 }
  0x17   :  { %p339_p10 = pnand %p337_p9, %p334_p8 }
  0x19   :  { %342 = shalt.err (!%p339_p10)
}
  0x1a   :  { %s343_s8 = scalar_lea.vmem %s433_s15, 128  ;;  %p348_p12 = scmp.lt.s32.totalorder %s433_s15, %s433_s15 }
  0x1b   :  { %p344_p11 = scmp.ne.s32.totalorder %s433_s15, %s343_s8  ;;  %p349_p13 = scmp.lt.s32.totalorder %s343_s8, %s343_s8 }
  0x1d   :  { %p350_p0 = por %p349_p13, %p348_p12 }
  0x1f   :  { %p351_p1 = pnand %p350_p0, %p344_p11 }
  0x21   :  { %354 = shalt.err (!%p351_p1)
}
  0x22   :  { %22 = dma.hbm_to_vmem [thread:$0]  %s497_s0, 128, %s433_s15, [#allocation4], %s407_s24, %s407_s24, %s408_s25  }
  0x23   :  { %s409_s10 = smov [#allocation8]   ;;  %s355_s14 = scalar_lea.hbm %s499_s2, 16 }
  0x24   :  { %s41_s11 = sshll.u32 %s409_s10, 4  ;;  %p356_p2 = scmp.ne.s32.totalorder %s499_s2, %s355_s14  ;;  %s42_s11 = int_to_ptr.vmem [resolvable:$true] %s41_s11 }
  0x25   :  { %p359_p3 = scmp.lt.u32.totalorder %s355_s14, %s499_s2 }
  0x27   :  { %p361_p4 = pnand %p359_p3, %p356_p2 }
  0x29   :  { %364 = shalt.err (!%p361_p4)
}
  0x2a   :  { %s365_s20 = scalar_lea.vmem %s42_s11, 16  ;;  %s369_s0 = scalar_lea.vmem %s42_s11, 32 }
  0x2b   :  { %p366_p5 = scmp.ne.s32.totalorder %s42_s11, %s365_s20  ;;  %p370_p6 = scmp.lt.s32.totalorder %s42_s11, %s42_s11 }
  0x2c   :  { %p371_p7 = scmp.lt.s32.totalorder %s369_s0, %s365_s20 }
  0x2e   :  { %p372_p8 = por %p371_p7, %p370_p6 }
  0x30   :  { %p373_p9 = pnand %p372_p8, %p366_p5 }
  0x32   :  { %376 = shalt.err (!%p373_p9)
}
  0x33   :  { %44 = dma.hbm_to_vmem [thread:$0]  %s499_s2, 16, %s42_s11, [#allocation7]  }
  0x34   :  { %399 = dma.done.wait [#allocation4], 128  }
  0x35   :  { %400 = vsyncadd [#allocation4], 4294967168 }
  0x36   :  { %401 = dma.done.wait [#allocation7], 1040  }
  0x37   :  { %402 = vsyncadd [#allocation7], 4294966256  ;;  %v410_v0 = vmov 0.0   ;;  %vm411_vm0 = vmmov 0   ;;  %v294_v1 = vld [vmem:[#allocation6] sm:$0xff]   ;;  %v295_v2 = vld [vmem:[#allocation6 + $0x8] sm:$0xff]  }
  0x38   :  { %266 = vmatprep.subr.bf16.mxu0 %v410_v0  ;;  %282 = vmatprep.mubr.msk.bf16.mxu0 %vm411_vm0, %v410_v0  ;;  %v296_v3 = vld [vmem:[#allocation6 + $0x10] sm:$0xff]   ;;  %v297_v4 = vld [vmem:[#allocation6 + $0x18] sm:$0xff]   ;;  %v298_v5 = vld [vmem:[#allocation6 + $0x20] sm:$0xff]   ;;  %s412_s2 = smov [#allocation9]  }
  0x39   :  { %267 = vmatpush3.bf16.msra.mxu0 %v294_v1  ;;  %v299_v6 = vld [vmem:[#allocation6 + $0x28] sm:$0xff]   ;;  %v300_v7 = vld [vmem:[#allocation6 + $0x30] sm:$0xff]   ;;  %v301_v8 = vld [vmem:[#allocation6 + $0x38] sm:$0xff]   ;;  %s223_s22 = sshll.u32 %s412_s2, 4  ;;  %s224_s22 = int_to_ptr.vmem [resolvable:$true] %s223_s22 }
  0x3a   :  { %268 = vmatprep.subr.bf16.mxu0 %v410_v0  ;;  %v302_v9 = vld [vmem:[#allocation3] sm:$0xff]   ;;  %v245_v10 = vld [vmem:[#allocation8] ss:$0 sm:$0xff]  ;;  %s377_s23 = scalar_lea.vmem %s224_s22, 128  ;;  %p382_p11 = scmp.lt.s32.totalorder %s224_s22, %s224_s22 }
  0x3b   :  { %p378_p10 = scmp.ne.s32.totalorder %s224_s22, %s377_s23  ;;  %p383_p12 = scmp.lt.s32.totalorder %s377_s23, %s377_s23 }
  0x3d   :  { %269 = vmatpush3.bf16.msra.mxu0 %v295_v2  ;;  %p384_p13 = por %p383_p12, %p382_p11 }
  0x3e   :  { %270 = vmatprep.subr.bf16.mxu0 %v410_v0 }
  0x3f   :  { %p385_p0 = pnand %p384_p13, %p378_p10 }
  0x41   :  { %271 = vmatpush3.bf16.msra.mxu0 %v296_v3 }
  0x42   :  { %272 = vmatprep.subr.bf16.mxu0 %v410_v0 }
  0x45   :  { %273 = vmatpush3.bf16.msra.mxu0 %v297_v4 }
  0x46   :  { %274 = vmatprep.subr.bf16.mxu0 %v410_v0 }
  0x49   :  { %275 = vmatpush3.bf16.msra.mxu0 %v298_v5 }
  0x4a   :  { %276 = vmatprep.subr.bf16.mxu0 %v410_v0 }
  0x4d   :  { %277 = vmatpush3.bf16.msra.mxu0 %v299_v6 }
  0x4e   :  { %278 = vmatprep.subr.bf16.mxu0 %v410_v0 }
  0x51   :  { %279 = vmatpush3.bf16.msra.mxu0 %v300_v7 }
  0x52   :  { %280 = vmatprep.subr.bf16.mxu0 %v410_v0 }
  0x55   :  { %281 = vmatpush3.bf16.msra.mxu0 %v301_v8 }
  0x58   :  { %283 = vmatmul.mubr.bf16.vlgmr.msra.gmra.mrb[0].mxu0 %v302_v9 }
 0x12b   :  { %v169_v11 = vpop.f32.mrb[0].mxu0 }
 0x12c   :  { %v192_v12 = vadd.f32 %v245_v10, %v169_v11  ;;  %v284_v13 = vpop.f32.mrb[1].mxu0 }
 0x12d   :  { %v172_v14 = vpop.f32.mrb[2].mxu0 }
 0x12e   :  { %v246_v15 = vmul.f32 -1.442695, %v192_v12  ;;  %v193_v16 = vadd.f32 %v245_v10, %v172_v14  ;;  %v285_v17 = vpop.f32.mrb[3].mxu0 }
 0x130   :  { %303 = vpow2.f32 %v246_v15  ;;  %v247_v18 = vmul.f32 -1.442695, %v193_v16 }
 0x132   :  { %305 = vpow2.f32 %v247_v18 }
 0x13a   :  { %v304_v19 = vpop.eup %303 }
 0x13b   :  { %v200_v20 = vadd.f32 1.0, %v304_v19 }
 0x13c   :  { %v306_v21 = vpop.eup %305 }
 0x13d   :  { %307 = vrcp.f32 %v200_v20  ;;  %v201_v22 = vadd.f32 1.0, %v306_v21 }
 0x13f   :  { %309 = vrcp.f32 %v201_v22 }
 0x147   :  { %v308_v23 = vpop.eup %307 }
 0x148   :  { %v206_v25 = vmul.f32 %v308_v23, %v192_v12 }
 0x149   :  { %v310_v24 = vpop.eup %309 }
 0x14a   :  { %v207_v26 = vmul.f32 %v310_v24, %v193_v16 }
 0x14c   :  { %v255_v27 = vpack.c.bf16 %v207_v26, %v206_v25 }
 0x14e   :  { %256 = vst [vmem:[#allocation9] sm:$0xff] %v255_v27  }
 0x14f   :  { %388 = shalt.err (!%p385_p0)
}
 0x150   :  { %s389_s28 = scalar_lea.hbm %s500_s3, 128 }
 0x151   :  { %p390_p1 = scmp.ne.s32.totalorder %s500_s3, %s389_s28  ;;  %p393_p2 = scmp.lt.u32.totalorder %s389_s28, %s500_s3 }
 0x153   :  { %p395_p3 = pnand %p393_p2, %p390_p1 }
 0x155   :  { %398 = shalt.err (!%p395_p3)
}
 0x156   :  { %229 = dma.vmem_to_hbm [thread:$0]  %s224_s22, 128, %s500_s3, [#allocation5], %s407_s24, %s407_s24, %s408_s25  }
 0x157   :  { %403 = dma.done.wait [#allocation5], 128  }
 0x158   :  { %404 = vsyncadd [#allocation5], 4294967168 }
 0x159   :  { %233 = vsyncpa [#allocation4], 1 }
 0x15a   :  { %234 = vsyncpa [#allocation7], 1 }
 0x15b   :  { %235 = vsyncpa [#allocation5], 1 }

</bundles_post_ra>
